<compile_context>
chip_gen: v6e
topology: v6e:2x2x1
jax: 0.10.0
libtpu: 0.0.40
codegen_flags: <defaults>
</compile_context>

<pallas_src>
import jax
import jax.numpy as jnp
from jax import lax
from jax.experimental import pallas as pl
from jax.experimental.pallas import tpu as pltpu


def _round_up(x, m):
    return (x + m - 1) // m * m


_LANES = 512            # lane width of the 2-D view: multiple of 128 (and of 4)
_MAX_BLOCK_ROWS = 1024  # 1024*512*4B = 2 MiB/block -> <= 8 MiB double-buffered


def _disc_kernel(x_ref, o_ref):
    """x_ref / o_ref: (rows, _LANES) views of the flat element stream.

    Each group of 4 consecutive lanes holds one matrix [a,b,c,d] =
    [M11,M12,M21,M22]; the same 4 lanes of the output receive
    [a^2+c^2, b^2+d^2, a*b+c*d, a*d-b*c].  All shuffles stay inside a group,
    built from circular lane rolls (XLU) + lane-parity selects (VPU).
    """
    x = x_ref[...].astype(jnp.float32)           # one full-tile load, fp32 math
    rows, n_lanes = x.shape
    # position within the group of 4 (depends only on the lane index since
    # n_lanes % 4 == 0)
    p = lax.broadcasted_iota(jnp.int32, (rows, n_lanes), 1) % 4

    def lroll(v, shift):                         # jnp.roll semantics along lanes
        return pltpu.roll(v, shift % n_lanes, axis=1)

    # partner 2 lanes away inside the group: [c, d, a, b]
    v2 = jnp.where(p < 2, lroll(x, -2), lroll(x, 2))
    even = (p % 2) == 0
    # adjacent partner inside each pair:       [b, a, d, c]
    v1 = jnp.where(even, lroll(x, -1), lroll(x, 1))
    # group reversal (pair-swap of v2):         [d, c, b, a]
    v3 = jnp.where(even, lroll(v2, -1), lroll(v2, 1))

    sq = x * x + v2 * v2          # lane p=0 -> s1 = a^2+c^2, p=1 -> s2 = b^2+d^2
    s3 = v2 * v3 + x * v1         # lane p=2 -> a*b + c*d
    s4 = v3 * x - v2 * v1         # lane p=3 -> a*d - b*c
    out = jnp.where(p < 2, sq, jnp.where(p == 2, s3, s4))

    # Single wide, fully dense store.
    o_ref[...] = out.astype(o_ref.dtype)


def discriminator_forward(M):
    """M: (B, 2, 2) -> (B, 4) features [|col1|^2, |col2|^2, col1.col2, det]."""
    B = M.shape[0]
    N = B * 4

    # Metadata-only flatten of the contiguous (B, 2, 2) input:
    # flat layout per matrix is [M11, M12, M21, M22].
    flat = M.reshape(N)

    padded_N = _round_up(N, _LANES)
    if padded_N != N:
        # <= _LANES - 4 elements of pad; only hit when B % (_LANES // 4) != 0.
        flat = jnp.pad(flat, (0, padded_N - N))
    R = padded_N // _LANES
    x2d = flat.reshape(R, _LANES)                # metadata-only reshape

    if R <= 8:
        blk_r = R                                # single full-dim row block
    else:
        # >= 2 grid steps (keeps both v7x TensorCores busy), rows multiple of 8,
        # capped so double-buffered in+out stays well under scoped VMEM defaults.
        blk_r = min(_MAX_BLOCK_ROWS, _round_up(pl.cdiv(R, 2), 8))
    grid = (pl.cdiv(R, blk_r),)                  # ragged last block is masked

    itemsize = jnp.dtype(M.dtype).itemsize
    out2d = pl.pallas_call(
        _disc_kernel,
        out_shape=jax.ShapeDtypeStruct((R, _LANES), M.dtype),
        grid=grid,
        in_specs=[pl.BlockSpec((blk_r, _LANES), lambda i: (i, 0))],
        out_specs=pl.BlockSpec((blk_r, _LANES), lambda i: (i, 0)),
        compiler_params=pltpu.CompilerParams(
            dimension_semantics=("parallel",)),
        cost_estimate=pl.CostEstimate(
            flops=12 * B,
            transcendentals=0,
            bytes_accessed=2 * padded_N * itemsize),
    )(x2d)

    out_flat = out2d.reshape(padded_N)
    if padded_N != N:
        out_flat = out_flat[:N]
    return out_flat.reshape(B, 4)                # rows are [s1, s2, s3, s4]


def _reference(M):
    M11 = M[:, 0, 0]
    M12 = M[:, 0, 1]
    M21 = M[:, 1, 0]
    M22 = M[:, 1, 1]
    s1 = M11 * M11 + M21 * M21
    s2 = M12 * M12 + M22 * M22
    s3 = M11 * M12 + M21 * M22
    s4 = M11 * M22 - M12 * M21
    return jnp.stack([s1, s2, s3, s4], axis=1)


if __name__ == "__main__":
    key = jax.random.PRNGKey(0)
    # 128: pad-free single-block path; 37: ragged batch (small pad);
    # 2048: multi-block grid path (2 parallel grid steps).
    for b in (128, 37, 2048):
        key, sub = jax.random.split(key)
        M = jax.random.normal(sub, (b, 2, 2), dtype=jnp.float32)
        out = jax.block_until_ready(discriminator_forward(M))
        ref = _reference(M)
        assert out.shape == (b, 4), (b, out.shape)
        assert jnp.allclose(out, ref, atol=1e-5, rtol=1e-5), (b, out, ref)
    print("KERNEL_OK")
</pallas_src>

<mosaic_0001>
module attributes {stable_mosaic.version = 11 : i64} {
  func.func @_disc_kernel(%arg0: i32, %arg1: memref<1x512xf32, #tpu.memory_space<vmem>>, %arg2: memref<1x512xf32, #tpu.memory_space<vmem>>) attributes {dimension_semantics = [#tpu.dimension_semantics<parallel>], iteration_bounds = array<i64: 1>, scalar_prefetch = 0 : i64, scratch_operands = 0 : i64, tpu.core_type = #tpu.core_type<tc>, window_params = [{transform_indices = @transform_0, window_bounds = array<i64: 1, 512>}, {transform_indices = @transform_1, window_bounds = array<i64: 1, 512>}]} {
    %c0 = arith.constant 0 : index
    %c0_0 = arith.constant 0 : index
    %0 = vector.load %arg1[%c0, %c0_0] : memref<1x512xf32, #tpu.memory_space<vmem>>, vector<1x512xf32>
    %1 = tpu.iota {dimensions = array<i32: 1>} : vector<1x512xi32>
    %c4_i32 = arith.constant 4 : i32
    %c0_i32 = arith.constant 0 : i32
    %2 = arith.cmpi eq, %c4_i32, %c0_i32 : i32
    %c1_i32 = arith.constant 1 : i32
    %3 = arith.select %2, %c1_i32, %c4_i32 : i32
    %4 = vector.broadcast %3 : i32 to vector<1x512xi32>
    %5 = arith.remsi %1, %4 : vector<1x512xi32>
    %c0_i32_1 = arith.constant 0 : i32
    %6 = vector.broadcast %c0_i32_1 : i32 to vector<1x512xi32>
    %7 = arith.cmpi ne, %5, %6 : vector<1x512xi32>
    %c0_i32_2 = arith.constant 0 : i32
    %8 = vector.broadcast %c0_i32_2 : i32 to vector<1x512xi32>
    %9 = arith.cmpi slt, %5, %8 : vector<1x512xi32>
    %c0_i32_3 = arith.constant 0 : i32
    %10 = arith.cmpi slt, %3, %c0_i32_3 : i32
    %11 = vector.broadcast %10 : i1 to vector<1x512xi1>
    %12 = vector.broadcast %11 : vector<1x512xi1> to vector<1x512xi1>
    %13 = arith.xori %9, %12 : vector<1x512xi1>
    %14 = arith.andi %13, %7 : vector<1x512xi1>
    %15 = vector.broadcast %3 : i32 to vector<1x512xi32>
    %16 = arith.addi %5, %15 : vector<1x512xi32>
    %17 = arith.select %14, %16, %5 : vector<1x512xi1>, vector<1x512xi32>
    %c2_i32 = arith.constant 2 : i32
    %18 = vector.broadcast %c2_i32 : i32 to vector<1x512xi32>
    %19 = arith.cmpi slt, %17, %18 : vector<1x512xi32>
    %c510_i32 = arith.constant 510 : i32
    %20 = tpu.dynamic_rotate %0 by %c510_i32 dim 1 : vector<1x512xf32>, i32 -> vector<1x512xf32>
    %c2_i32_4 = arith.constant 2 : i32
    %21 = tpu.dynamic_rotate %0 by %c2_i32_4 dim 1 : vector<1x512xf32>, i32 -> vector<1x512xf32>
    %22 = arith.select %19, %20, %21 : vector<1x512xi1>, vector<1x512xf32>
    %c2_i32_5 = arith.constant 2 : i32
    %c0_i32_6 = arith.constant 0 : i32
    %23 = arith.cmpi eq, %c2_i32_5, %c0_i32_6 : i32
    %c1_i32_7 = arith.constant 1 : i32
    %24 = arith.select %23, %c1_i32_7, %c2_i32_5 : i32
    %25 = vector.broadcast %24 : i32 to vector<1x512xi32>
    %26 = arith.remsi %17, %25 : vector<1x512xi32>
    %c0_i32_8 = arith.constant 0 : i32
    %27 = vector.broadcast %c0_i32_8 : i32 to vector<1x512xi32>
    %28 = arith.cmpi ne, %26, %27 : vector<1x512xi32>
    %c0_i32_9 = arith.constant 0 : i32
    %29 = vector.broadcast %c0_i32_9 : i32 to vector<1x512xi32>
    %30 = arith.cmpi slt, %26, %29 : vector<1x512xi32>
    %c0_i32_10 = arith.constant 0 : i32
    %31 = arith.cmpi slt, %24, %c0_i32_10 : i32
    %32 = vector.broadcast %31 : i1 to vector<1x512xi1>
    %33 = vector.broadcast %32 : vector<1x512xi1> to vector<1x512xi1>
    %34 = arith.xori %30, %33 : vector<1x512xi1>
    %35 = arith.andi %34, %28 : vector<1x512xi1>
    %36 = vector.broadcast %24 : i32 to vector<1x512xi32>
    %37 = arith.addi %26, %36 : vector<1x512xi32>
    %38 = arith.select %35, %37, %26 : vector<1x512xi1>, vector<1x512xi32>
    %c0_i32_11 = arith.constant 0 : i32
    %39 = vector.broadcast %c0_i32_11 : i32 to vector<1x512xi32>
    %40 = arith.cmpi eq, %38, %39 : vector<1x512xi32>
    %c511_i32 = arith.constant 511 : i32
    %41 = tpu.dynamic_rotate %0 by %c511_i32 dim 1 : vector<1x512xf32>, i32 -> vector<1x512xf32>
    %c1_i32_12 = arith.constant 1 : i32
    %42 = tpu.dynamic_rotate %0 by %c1_i32_12 dim 1 : vector<1x512xf32>, i32 -> vector<1x512xf32>
    %43 = arith.select %40, %41, %42 : vector<1x512xi1>, vector<1x512xf32>
    %c511_i32_13 = arith.constant 511 : i32
    %44 = tpu.dynamic_rotate %22 by %c511_i32_13 dim 1 : vector<1x512xf32>, i32 -> vector<1x512xf32>
    %c1_i32_14 = arith.constant 1 : i32
    %45 = tpu.dynamic_rotate %22 by %c1_i32_14 dim 1 : vector<1x512xf32>, i32 -> vector<1x512xf32>
    %46 = arith.select %40, %44, %45 : vector<1x512xi1>, vector<1x512xf32>
    %47 = arith.mulf %0, %0 : vector<1x512xf32>
    %48 = arith.mulf %22, %22 : vector<1x512xf32>
    %49 = arith.addf %47, %48 : vector<1x512xf32>
    %50 = arith.mulf %22, %46 : vector<1x512xf32>
    %51 = arith.mulf %0, %43 : vector<1x512xf32>
    %52 = arith.addf %50, %51 : vector<1x512xf32>
    %53 = arith.mulf %46, %0 : vector<1x512xf32>
    %54 = arith.mulf %22, %43 : vector<1x512xf32>
    %55 = arith.subf %53, %54 : vector<1x512xf32>
    %c2_i32_15 = arith.constant 2 : i32
    %56 = vector.broadcast %c2_i32_15 : i32 to vector<1x512xi32>
    %57 = arith.cmpi slt, %17, %56 : vector<1x512xi32>
    %c2_i32_16 = arith.constant 2 : i32
    %58 = vector.broadcast %c2_i32_16 : i32 to vector<1x512xi32>
    %59 = arith.cmpi eq, %17, %58 : vector<1x512xi32>
    %60 = arith.select %59, %52, %55 : vector<1x512xi1>, vector<1x512xf32>
    %61 = arith.select %57, %49, %60 : vector<1x512xi1>, vector<1x512xf32>
    %c0_17 = arith.constant 0 : index
    %c0_18 = arith.constant 0 : index
    %62 = vector.load %arg2[%c0_17, %c0_18] : memref<1x512xf32, #tpu.memory_space<vmem>>, vector<1x512xf32>
    tpu.vector_store %arg2[%c0_17, %c0_18], %61 {strides = array<i32>} : memref<1x512xf32, #tpu.memory_space<vmem>>, vector<1x512xf32>,
    return
  }
  func.func @transform_0(%arg0: i32) -> (i32, i32) {
    %c0_i32 = arith.constant 0 : i32
    %c0_i32_0 = arith.constant 0 : i32
    return %arg0, %c0_i32 : i32, i32
  }
  func.func @transform_1(%arg0: i32) -> (i32, i32) {
    %c0_i32 = arith.constant 0 : i32
    %c0_i32_0 = arith.constant 0 : i32
    return %arg0, %c0_i32 : i32, i32
  }
}

</mosaic_0001>

<bundles_post_ra>
// kernel: tpu_custom_call.1
= control target key start
LH: loop header
LB: loop body
LE: loop exit
PB: predicated region body
PF: predicated region fallthrough
CT: control target
= control target key end

     0   :  { %6 = vsyncpa [#allocation3], 0  ;;  %s758_s0 = inlined_call_operand.hbm [shape: f32[1,512], index: 0, kind: input, shape index: {}]   ;;  %s759_s1 = inlined_call_operand.hbm [shape: f32[1,512], index: 1, kind: output, shape index: {}]  }
   0x1   :  { %7 = vsyncpa [#allocation4], 0  ;;  %s479_s6 = smov [#allocation2]  }
   0x2   :  { %s14_s7 = sshll.u32 %s479_s6, 4  ;;  %s15_s7 = int_to_ptr.vmem [resolvable:$true] %s14_s7 }
   0x3   :  { %s443_s8 = scalar_lea.vmem %s15_s7, 64  ;;  %p448_p1 = scmp.lt.s32.totalorder %s15_s7, %s15_s7 }
   0x4   :  { %p444_p0 = scmp.ne.s32.totalorder %s15_s7, %s443_s8  ;;  %p449_p2 = scmp.lt.s32.totalorder %s443_s8, %s443_s8 }
   0x6   :  { %p450_p3 = por %p449_p2, %p448_p1 }
   0x8   :  { %p451_p4 = pnand %p450_p3, %p444_p0 }
   0xa   :  { %454 = shalt.err (!%p451_p4)
}
   0xb   :  { %17 = dma.hbm_to_vmem [thread:$0]  %s758_s0, 64, %s15_s7, [#allocation3]  }
   0xc   :  { %475 = dma.done.wait [#allocation3], 64  }
   0xd   :  { %476 = vsyncadd [#allocation3], 4294967232  ;;  %v22_v0 = vlaneseq  ;;  %v514_v6 = vld [vmem:[#allocation2] sm:$0xf]  ;;  %s480_s0 = smov 126   ;;  %s481_s11 = smov 2  }
   0xe   :  { %s482_s12 = smov 127   ;;  %s483_s13 = smov 1   ;;  %v484_v43 = vmov 1966171168  }
   0xf   :  { %v500_v1 = vshrl.u32 %v22_v0, 7  ;;  %v557_v11 = vand.u32 127, %v22_v0  ;;  %v252_v44 = vunpack.c.l.s4 %v484_v43  ;;  %s485_s14 = smov [#allocation5]  }
  0x10   :  { %s419_s15 = sshll.u32 %s485_s14, 4  ;;  %s420_s15 = int_to_ptr.vmem [resolvable:$true] %s419_s15 }
  0x11   :  { %v503_v2 = vsub.s32 2, %v500_v1  ;;  %v506_v3 = vsub.s32 0, %v500_v1  ;;  %v509_v4 = vsub.s32 3, %v500_v1  ;;  %v512_v5 = vsub.s32 1, %v500_v1  ;;  %s455_s16 = scalar_lea.vmem %s420_s15, 64  ;;  %p460_p6 = scmp.lt.s32.totalorder %s420_s15, %s420_s15 }
  0x12   :  { %v24_v12 = vadd.s32 128, %v557_v11  ;;  %v26_v16 = vadd.s32 384, %v557_v11  ;;  %vm108_vm0 = vcmp.lt.s32.totalorder %v557_v11, 126  ;;  %vm121_vm1 = vcmp.lt.s32.totalorder %v557_v11, 2  ;;  %p456_p5 = scmp.ne.s32.totalorder %s420_s15, %s455_s16  ;;  %p461_p7 = scmp.lt.s32.totalorder %s455_s16, %s455_s16 }
  0x13   :  { %v518_v7 = vrot.slane %v514_v6, %v503_v2  ;;  %v522_v8 = vrot.slane %v514_v6, %v506_v3  ;;  %v528_v9 = vrot.slane %v514_v6, %v509_v4  ;;  %v532_v10 = vrot.slane %v514_v6, %v512_v5 }
  0x14   :  { %v560_v15 = vand.u32 3, %v24_v12  ;;  %v567_v19 = vand.u32 3, %v557_v11  ;;  %v25_v20 = vadd.s32 256, %v557_v11  ;;  %v570_v21 = vand.u32 3, %v26_v16  ;;  %p462_p8 = por %p461_p7, %p460_p6 }
  0x15   :  { %104 = vrot.lane.b32.xlu1 %v518_v7, %s480_s0  ;;  %100 = vrot.lane.b32.xlu0 %v522_v8, %s480_s0  ;;  %vm190_vm6 = vcmp.lt.s32.totalorder %v557_v11, 127  ;;  %vm203_vm7 = vcmp.lt.s32.totalorder %v557_v11, 1  ;;  %v253_v51 = vunpack.c.0.s8 %v252_v44 }
  0x16   :  { %vm76_vm2 = vcmp.lt.s32.totalorder %v560_v15, 2  ;;  %vm75_vm3 = vcmp.lt.s32.totalorder %v567_v19, 2  ;;  %v583_v27 = vand.u32 3, %v25_v20  ;;  %vm78_vm4 = vcmp.lt.s32.totalorder %v570_v21, 2  ;;  %p463_p9 = pnand %p462_p8, %p456_p5 }
  0x17   :  { %v141_v45 = vand.u32 1, %v560_v15  ;;  %v134_v46 = vand.u32 1, %v567_v19  ;;  %v155_v48 = vand.u32 1, %v570_v21  ;;  %v672_v20 = vsub.s32 %v253_v51, %v500_v1 }
  0x18   :  { %vm77_vm5 = vcmp.lt.s32.totalorder %v583_v27, 2  ;;  %v148_v47 = vand.u32 1, %v583_v27  ;;  %vm346_vm12 = vcmp.eq.s32.totalorder %v567_v19, 2  ;;  %vm347_vm13 = vcmp.eq.s32.totalorder %v560_v15, 2 }
  0x19   :  { %106 = vrot.lane.b32.xlu1 %v528_v9, %s480_s0  ;;  %102 = vrot.lane.b32.xlu0 %v532_v10, %s480_s0  ;;  %vm629_vm8 = vcmp.eq.s32.totalorder %v141_v45, 0  ;;  %vm635_vm9 = vcmp.eq.s32.totalorder %v134_v46, 0  ;;  %vm643_vm11 = vcmp.eq.s32.totalorder %v155_v48, 0  ;;  %vm348_vm14 = vcmp.eq.s32.totalorder %v583_v27, 2 }
  0x1a   :  { %vm639_vm10 = vcmp.eq.s32.totalorder %v148_v47, 0  ;;  %vm349_vm15 = vcmp.eq.s32.totalorder %v570_v21, 2 }
  0x1d   :  { %115 = vrot.lane.b32.xlu1 %v532_v10, %s481_s11  ;;  %113 = vrot.lane.b32.xlu0 %v522_v8, %s481_s11 }
  0x21   :  { %119 = vrot.lane.b32.xlu1 %v528_v9, %s481_s11  ;;  %117 = vrot.lane.b32.xlu0 %v518_v7, %s481_s11 }
  0x25   :  { %184 = vrot.lane.b32.xlu1 %v532_v10, %s482_s12  ;;  %182 = vrot.lane.b32.xlu0 %v522_v8, %s482_s12 }
  0x29   :  { %188 = vrot.lane.b32.xlu1 %v528_v9, %s482_s12  ;;  %186 = vrot.lane.b32.xlu0 %v518_v7, %s482_s12 }
  0x2d   :  { %197 = vrot.lane.b32.xlu1 %v532_v10, %s483_s13  ;;  %195 = vrot.lane.b32.xlu0 %v522_v8, %s483_s13 }
  0x31   :  { %201 = vrot.lane.b32.xlu1 %v528_v9, %s483_s13  ;;  %199 = vrot.lane.b32.xlu0 %v518_v7, %s483_s13 }
  0x87   :  { %v105_v13 = vpop.permute.xlu1 %104  ;;  %v101_v14 = vpop.permute.xlu0 %100 }
  0x8b   :  { %v107_v17 = vpop.permute.xlu1 %106  ;;  %v103_v18 = vpop.permute.xlu0 %102 }
  0x8c   :  { %v110_v24 = vsel %vm108_vm0, %v103_v18, %v105_v13  ;;  %v112_v30 = vsel %vm108_vm0, %v107_v17, %v101_v14  ;;  %v111_v31 = vsel %vm108_vm0, %v101_v14, %v103_v18  ;;  %v109_v39 = vsel %vm108_vm0, %v105_v13, %v107_v17 }
  0x8d   :  { %vm410_vm0 = vcmp.lt.s32.totalorder %v22_v0, 512 }
  0x8f   :  { %v116_v22 = vpop.permute.xlu1 %115  ;;  %v114_v23 = vpop.permute.xlu0 %113 }
  0x90   :  { %v124_v25 = vsel %vm121_vm1, %v114_v23, %v116_v22 }
  0x91   :  { %v578_v26 = vsel %vm76_vm2, %v110_v24, %v124_v25 }
  0x92   :  { %214 = vrot.lane.b32.xlu1 %v578_v26, %s482_s12  ;;  %v242_v1 = vmul.f32 %v578_v26, %v578_v26 }
  0x93   :  { %v120_v28 = vpop.permute.xlu1 %119  ;;  %v118_v29 = vpop.permute.xlu0 %117 }
  0x94   :  { %v125_v32 = vsel %vm121_vm1, %v120_v28, %v114_v23  ;;  %v122_v33 = vsel %vm121_vm1, %v118_v29, %v120_v28  ;;  %v123_v36 = vsel %vm121_vm1, %v116_v22, %v118_v29 }
  0x95   :  { %v596_v34 = vsel %vm75_vm3, %v111_v31, %v125_v32  ;;  %v600_v35 = vsel %vm78_vm4, %v112_v30, %v122_v33  ;;  %v613_v40 = vsel %vm77_vm5, %v109_v39, %v123_v36 }
  0x96   :  { %212 = vrot.lane.b32.xlu0 %v596_v34, %s482_s12  ;;  %218 = vrot.lane.b32.xlu1 %v600_v35, %s482_s12  ;;  %v241_v30 = vmul.f32 %v596_v34, %v596_v34  ;;  %v243_v31 = vmul.f32 %v613_v40, %v613_v40  ;;  %v244_v32 = vmul.f32 %v600_v35, %v600_v35 }
  0x97   :  { %v185_v37 = vpop.permute.xlu1 %184  ;;  %v183_v38 = vpop.permute.xlu0 %182 }
  0x98   :  { %v193_v53 = vsel %vm190_vm6, %v183_v38, %v185_v37  ;;  %v249_v33 = vcombine.low %v241_v30, %v242_v1  ;;  %v250_v36 = vcombine.low %v243_v31, %v244_v32 }
  0x9a   :  { %216 = vrot.lane.b32.xlu0 %v613_v40, %s482_s12  ;;  %226 = vrot.lane.b32.xlu1 %v578_v26, %s483_s13 }
  0x9b   :  { %v189_v41 = vpop.permute.xlu1 %188  ;;  %v187_v42 = vpop.permute.xlu0 %186 }
  0x9c   :  { %v194_v57 = vsel %vm190_vm6, %v189_v41, %v183_v38  ;;  %v191_v58 = vsel %vm190_vm6, %v187_v42, %v189_v41  ;;  %v192_v59 = vsel %vm190_vm6, %v185_v37, %v187_v42  ;;  %v257_v37 = vrot.slane %v249_v33, %v672_v20 }
  0x9d   :  { %v264_v38 = vrot.slane %v250_v36, %v672_v20  ;;  %v240_v42 = vmul.f32 %v514_v6, %v514_v6 }
  0x9e   :  { %224 = vrot.lane.b32.xlu0 %v596_v34, %s483_s13  ;;  %230 = vrot.lane.b32.xlu1 %v600_v35, %s483_s13 }
  0x9f   :  { %v198_v49 = vpop.permute.xlu1 %197  ;;  %v196_v50 = vpop.permute.xlu0 %195  ;;  %v265_v39 = vcombine.low %v257_v37, %v264_v38 }
  0xa0   :  { %v206_v60 = vsel %vm203_vm7, %v196_v50, %v198_v49 }
  0xa1   :  { %v209_v14 = vsel %vm629_vm8, %v192_v59, %v206_v60  ;;  %v272_v43 = vrot.slane %v265_v39, %v672_v20 }
  0xa2   :  { %228 = vrot.lane.b32.xlu0 %v613_v40, %s483_s13 }
  0xa3   :  { %v202_v61 = vpop.permute.xlu1 %201  ;;  %v200_v62 = vpop.permute.xlu0 %199  ;;  %v274_v46 = vadd.f32 %v272_v43, %v240_v42 }
  0xa4   :  { %v207_v63 = vsel %vm203_vm7, %v202_v61, %v196_v50  ;;  %v204_v12 = vsel %vm203_vm7, %v200_v62, %v202_v61  ;;  %v205_v13 = vsel %vm203_vm7, %v198_v49, %v200_v62  ;;  %v339_v50 = vmul.f32 %v209_v14, %v578_v26 }
  0xa5   :  { %v208_v16 = vsel %vm635_vm9, %v193_v53, %v207_v63  ;;  %v210_v17 = vsel %vm639_vm10, %v191_v58, %v205_v13  ;;  %v211_v18 = vsel %vm643_vm11, %v194_v57, %v204_v12  ;;  %v358_v58 = vrot.slane %v274_v46, %v506_v3 }
  0xa6   :  { %v283_v22 = vcombine.low %v208_v16, %v209_v14  ;;  %v284_v23 = vcombine.low %v210_v17, %v211_v18  ;;  %v338_v51 = vmul.f32 %v208_v16, %v596_v34  ;;  %v362_v59 = vrot.slane %v274_v46, %v512_v5 }
  0xa8   :  { %v291_v24 = vrot.slane %v283_v22, %v672_v20  ;;  %v298_v25 = vrot.slane %v284_v23, %v672_v20 }
  0xaa   :  { %v299_v28 = vcombine.low %v291_v24, %v298_v25  ;;  %v340_v25 = vmul.f32 %v210_v17, %v613_v40 }
  0xac   :  { %v306_v29 = vrot.slane %v299_v28, %v672_v20 }
  0xae   :  { %v308_v49 = vmul.f32 %v306_v29, %v514_v6 }
  0xb0   :  { %v313_v63 = vrot.slane %v308_v49, %v506_v3  ;;  %v317_v12 = vrot.slane %v308_v49, %v512_v5  ;;  %v341_v3 = vmul.f32 %v211_v18, %v600_v35  ;;  %v321_v5 = vrot.slane %v308_v49, %v503_v2 }
  0xb1   :  { %v325_v54 = vrot.slane %v308_v49, %v509_v4 }
 0x104   :  { %v215_v41 = vpop.permute.xlu1 %214 }
 0x108   :  { %v219_v44 = vpop.permute.xlu1 %218  ;;  %v213_v45 = vpop.permute.xlu0 %212 }
 0x109   :  { %v222_v60 = vsel %vm190_vm6, %v213_v45, %v215_v41 }
 0x10c   :  { %v227_v47 = vpop.permute.xlu1 %226  ;;  %v217_v48 = vpop.permute.xlu0 %216 }
 0x10d   :  { %v221_v6 = vsel %vm190_vm6, %v215_v41, %v217_v48 }
 0x110   :  { %v231_v53 = vpop.permute.xlu1 %230  ;;  %v225_v57 = vpop.permute.xlu0 %224 }
 0x111   :  { %v234_v61 = vsel %vm203_vm7, %v225_v57, %v227_v47  ;;  %v235_v62 = vsel %vm203_vm7, %v231_v53, %v225_v57 }
 0x112   :  { %v236_v13 = vsel %vm635_vm9, %v222_v60, %v235_v62  ;;  %v237_v14 = vsel %vm629_vm8, %v221_v6, %v234_v61 }
 0x113   :  { %v275_v16 = vmul.f32 %v236_v13, %v596_v34  ;;  %v276_v22 = vmul.f32 %v237_v14, %v578_v26  ;;  %v334_v23 = vmul.f32 %v236_v13, %v522_v8  ;;  %v335_v24 = vmul.f32 %v237_v14, %v532_v10 }
 0x114   :  { %v229_v28 = vpop.permute.xlu0 %228  ;;  %v223_v26 = vsel %vm190_vm6, %v219_v44, %v213_v45  ;;  %v220_v8 = vsel %vm190_vm6, %v217_v48, %v219_v44 }
 0x115   :  { %v330_v29 = vadd.f32 %v313_v63, %v275_v16  ;;  %v331_v52 = vadd.f32 %v317_v12, %v276_v22  ;;  %v342_v30 = vsub.f32 %v334_v23, %v338_v51  ;;  %v343_v31 = vsub.f32 %v335_v24, %v339_v50 }
 0x116   :  { %v232_v10 = vsel %vm203_vm7, %v229_v28, %v231_v53  ;;  %v233_v34 = vsel %vm203_vm7, %v227_v47, %v229_v28 }
 0x117   :  { %v350_v17 = vsel %vm346_vm12, %v330_v29, %v342_v30  ;;  %v351_v18 = vsel %vm347_vm13, %v331_v52, %v343_v31  ;;  %v238_v32 = vsel %vm639_vm10, %v220_v8, %v233_v34  ;;  %v239_v1 = vsel %vm643_vm11, %v223_v26, %v232_v10 }
 0x118   :  { %v277_v33 = vmul.f32 %v238_v32, %v613_v40  ;;  %v278_v36 = vmul.f32 %v239_v1, %v600_v35  ;;  %v336_v37 = vmul.f32 %v238_v32, %v518_v7  ;;  %v337_v11 = vmul.f32 %v239_v1, %v528_v9 }
 0x119   :  { %v375_v38 = vsel %vm75_vm3, %v358_v58, %v350_v17  ;;  %v376_v55 = vsel %vm76_vm2, %v362_v59, %v351_v18  ;;  %v366_v35 = vrot.slane %v274_v46, %v503_v2  ;;  %v370_v7 = vrot.slane %v274_v46, %v509_v4 }
 0x11a   :  { %v332_v56 = vadd.f32 %v321_v5, %v277_v33  ;;  %v333_v39 = vadd.f32 %v325_v54, %v278_v36  ;;  %v344_v41 = vsub.f32 %v336_v37, %v340_v25  ;;  %v345_v40 = vsub.f32 %v337_v11, %v341_v3 }
 0x11b   :  { %v383_v42 = vcombine.low %v375_v38, %v376_v55 }
 0x11c   :  { %v352_v9 = vsel %vm348_vm14, %v332_v56, %v344_v41  ;;  %v353_v43 = vsel %vm349_vm15, %v333_v39, %v345_v40 }
 0x11d   :  { %v377_v44 = vsel %vm77_vm5, %v366_v35, %v352_v9  ;;  %v378_v19 = vsel %vm78_vm4, %v370_v7, %v353_v43  ;;  %v391_v15 = vrot.slane %v383_v42, %v672_v20 }
 0x11e   :  { %v384_v45 = vcombine.low %v377_v44, %v378_v19 }
 0x120   :  { %v398_v47 = vrot.slane %v384_v45, %v672_v20 }
 0x122   :  { %v399_v48 = vcombine.low %v391_v15, %v398_v47 }
 0x124   :  { %v406_v2 = vrot.slane %v399_v48, %v672_v20 }
 0x126   :  { %412 = vst.msk [vmem:[#allocation5] sm:$0xf] %vm410_vm0, %v406_v2 }
 0x127   :  { %466 = shalt.err (!%p463_p9)
}
 0x128   :  { %422 = dma.vmem_to_hbm [thread:$0]  %s420_s15, 64, %s759_s1, [#allocation4]  }
 0x129   :  { %477 = dma.done.wait [#allocation4], 64  }
 0x12a   :  { %478 = vsyncadd [#allocation4], 4294967232 }
 0x12b   :  { %426 = vsyncpa [#allocation3], 1 }
 0x12c   :  { %427 = vsyncpa [#allocation4], 1 }

</bundles_post_ra>
